<compile_context>
chip_gen: v6e
topology: v6e:2x2x1
jax: 0.10.0
libtpu: 0.0.40
codegen_flags: <defaults>
</compile_context>

<pallas_src>
import functools

import jax
import jax.numpy as jnp
from jax.experimental import pallas as pl
from jax.experimental.pallas import tpu as pltpu


# ----------------------------------------------------------------------------
# helpers
# ----------------------------------------------------------------------------
def _round_up(x, m):
    return ((x + m - 1) // m) * m


_TARGET_TILE_BYTES = 2 * 1024 * 1024  # >= ~2 MiB per x-tile DMA


def _vmem_budget():
    """Generation-aware (working budget, scoped-limit cap) in bytes."""
    try:
        info = pltpu.get_tpu_info()
        cap = int(getattr(info, "vmem_capacity_bytes", 0)) or 64 * 1024 * 1024
    except Exception:
        cap = 64 * 1024 * 1024  # conservative: assume the smallest (v7x)
    if cap <= 64 * 1024 * 1024:               # v7x: 64 MiB per TensorCore
        return 48 * 1024 * 1024, 56 * 1024 * 1024
    return 96 * 1024 * 1024, 112 * 1024 * 1024  # v5e / v6e: 128 MiB physical


def _compiler_params(vmem_estimate, limit_cap, semantics):
    limit = min(limit_cap, max(32 * 1024 * 1024, int(vmem_estimate * 1.25)))
    # TODO(synk): verify "parallel" actually shards the row axis across the two
    # v7x TensorCores; if not, switch to pltpu.CORE_PARALLEL / a core_map.
    return pltpu.CompilerParams(
        dimension_semantics=semantics,
        vmem_limit_bytes=limit,
    )


def _pick_tiles(rows, din, dout, itemsize, budget_bytes, *, has_weight=True,
                target_bytes=_TARGET_TILE_BYTES):
    """Pick (bm, tn): bm from a byte target (amortize ~0.35us/step overhead),
    tn (Dout tile) shrunk before bm when VMEM is tight."""
    bm = max(8, target_bytes // max(1, din * itemsize))
    if bm >= rows:
        bm = rows                      # full-extent block is always legal
    else:
        bm = max(8, (bm // 8) * 8)
    tn = dout

    def est(bm_, tn_):
        x_tile = bm_ * din * itemsize
        o_tile = bm_ * tn_ * itemsize
        w_bytes = din * tn_ * itemsize if has_weight else 0  # single-buffered
        p_bytes = (2 * din + tn_) * 4                        # gamma/beta/bias
        return 2 * (x_tile + o_tile) + w_bytes + p_bytes + (1 << 20)

    # 1) shrink the Dout tile first (keeps bm large for MXU/DMA efficiency)
    while est(bm, tn) > budget_bytes and tn > 128:
        tn = max(128, _round_up(tn // 2, 128))
    # 2) then shrink bm, trying to keep it >= 256 rows
    while est(bm, tn) > budget_bytes and bm > 256:
        bm = max(256, (bm // 2 // 8) * 8)
    # 3) last resort
    while est(bm, tn) > budget_bytes and bm > 8:
        bm = max(8, (bm // 2 // 8) * 8)
    return bm, tn, est(bm, tn)


def _make_spec(shape, index_map, single_buffer):
    """BlockSpec; single-buffered (Buffered(1)) for grid-invariant operands."""
    if single_buffer:
        return pl.BlockSpec(shape, index_map, pipeline_mode=pl.Buffered(1))
    return pl.BlockSpec(shape, index_map)


# ----------------------------------------------------------------------------
# Fused PreNorm(+Linear) kernel: one grid step handles a (bm, Din) row tile of
# the flattened (B*S, Din) input — normalize over the lane axis (E[x^2]-mean^2
# variance), affine, then one MXU matmul against the VMEM-resident (Din, tn)
# weight tile with the bias folded into the epilogue.
# ----------------------------------------------------------------------------
def _prenorm_linear_kernel(x_ref, gamma_ref, beta_ref, w_ref, b_ref, o_ref,
                           *, eps, mxu_dtype):
    x = x_ref[...].astype(jnp.float32)                        # (bm, Din)
    mean = jnp.mean(x, axis=-1, keepdims=True)                # independent
    mean_sq = jnp.mean(x * x, axis=-1, keepdims=True)         # reductions
    var = jnp.maximum(mean_sq - mean * mean, 0.0)
    inv = jax.lax.rsqrt(var + eps)
    y = (x - mean) * inv * gamma_ref[...].astype(jnp.float32) \
        + beta_ref[...].astype(jnp.float32)
    md = mxu_dtype if mxu_dtype is not None else w_ref.dtype
    acc = jnp.dot(y.astype(md), w_ref[...].astype(md),
                  preferred_element_type=jnp.float32)         # (bm, tn)
    acc = acc + b_ref[...].astype(jnp.float32)
    o_ref[...] = acc.astype(o_ref.dtype)


def prenorm_linear_pallas(x2d, gamma, beta, w, b, *, eps=1e-5, mxu_dtype=None):
    """Fused LayerNorm(x2d) @ w + b.  x2d: (R, Din), w: (Din, Dout)."""
    R, Din = x2d.shape
    Dout = w.shape[1]
    itemsize = jnp.dtype(x2d.dtype).itemsize
    budget, limit_cap = _vmem_budget()
    bm, tn, vmem_est = _pick_tiles(R, Din, Dout, itemsize, budget)
    n_row, n_col = pl.cdiv(R, bm), pl.cdiv(Dout, tn)
    # TODO(synk): for Dout < 128, lane-pack k=128/Dout row groups (block-diag
    # weight + segmented LN reductions) to avoid masked vst / quarter-filled
    # lanes; skipped — not worth it at these TabTransformer dims.

    def build(single_buffer):
        w_single = single_buffer and (n_col == 1)   # only if grid-invariant
        return pl.pallas_call(
            functools.partial(_prenorm_linear_kernel, eps=eps,
                              mxu_dtype=mxu_dtype),
            out_shape=jax.ShapeDtypeStruct((R, Dout), x2d.dtype),
            grid_spec=pltpu.PrefetchScalarGridSpec(
                num_scalar_prefetch=0,
                grid=(n_row, n_col),
                in_specs=[
                    pl.BlockSpec((bm, Din), lambda i, j: (i, 0)),
                    _make_spec((1, Din), lambda i, j: (0, 0), single_buffer),
                    _make_spec((1, Din), lambda i, j: (0, 0), single_buffer),
                    _make_spec((Din, tn), lambda i, j: (0, j), w_single),
                    _make_spec((1, tn), lambda i, j: (0, j), w_single),
                ],
                out_specs=pl.BlockSpec((bm, tn), lambda i, j: (i, j)),
            ),
            compiler_params=_compiler_params(vmem_est, limit_cap,
                                             ("parallel", "parallel")),
        )(x2d, gamma.reshape(1, Din), beta.reshape(1, Din), w,
          b.reshape(1, Dout))

    try:
        return build(True)
    except Exception:
        # Fall back to default double-buffered specs if Buffered(1) is
        # rejected by this Pallas version — kernel must always run.
        return build(False)


# ----------------------------------------------------------------------------
# Standalone LayerNorm kernel with optional fused elementwise epilogue
# (for PreNorm wrapping a non-Linear fn).
# ----------------------------------------------------------------------------
def _layernorm_kernel(x_ref, gamma_ref, beta_ref, o_ref, *, eps, epilogue):
    x = x_ref[...].astype(jnp.float32)
    mean = jnp.mean(x, axis=-1, keepdims=True)
    mean_sq = jnp.mean(x * x, axis=-1, keepdims=True)
    var = jnp.maximum(mean_sq - mean * mean, 0.0)
    inv = jax.lax.rsqrt(var + eps)
    y = (x - mean) * inv * gamma_ref[...].astype(jnp.float32) \
        + beta_ref[...].astype(jnp.float32)
    if epilogue is not None:
        y = epilogue(y)
    o_ref[...] = y.astype(o_ref.dtype)


def layernorm_pallas(x2d, gamma, beta, *, eps=1e-5, epilogue=None):
    R, D = x2d.shape
    itemsize = jnp.dtype(x2d.dtype).itemsize
    budget, limit_cap = _vmem_budget()
    bm, _, vmem_est = _pick_tiles(R, D, D, itemsize, budget, has_weight=False)

    def build(single_buffer):
        return pl.pallas_call(
            functools.partial(_layernorm_kernel, eps=eps, epilogue=epilogue),
            out_shape=jax.ShapeDtypeStruct((R, D), x2d.dtype),
            grid_spec=pltpu.PrefetchScalarGridSpec(
                num_scalar_prefetch=0,
                grid=(pl.cdiv(R, bm),),
                in_specs=[
                    pl.BlockSpec((bm, D), lambda i: (i, 0)),
                    _make_spec((1, D), lambda i: (0, 0), single_buffer),
                    _make_spec((1, D), lambda i: (0, 0), single_buffer),
                ],
                out_specs=pl.BlockSpec((bm, D), lambda i: (i, 0)),
            ),
            compiler_params=_compiler_params(vmem_est, limit_cap,
                                             ("parallel",)),
        )(x2d, gamma.reshape(1, D), beta.reshape(1, D))

    try:
        return build(True)
    except Exception:
        return build(False)


# ----------------------------------------------------------------------------
# PreNorm wrapper: fn(LayerNorm(x), **kwargs)
#   - linear_params=(w, b): fn is nn.Linear -> whole forward is ONE fused call.
#   - elementwise_fn: simple elementwise fn fused into the LN kernel epilogue.
#   - fn: arbitrary callable applied to the Pallas-LayerNorm'd tensor.
# ----------------------------------------------------------------------------
class PreNormPallas:
    def __init__(self, dim, fn=None, *, linear_params=None, elementwise_fn=None,
                 gamma=None, beta=None, eps=1e-5, mxu_dtype=None):
        self.dim = dim
        self.fn = fn
        self.linear_params = linear_params
        self.elementwise_fn = elementwise_fn
        self.eps = eps
        self.mxu_dtype = mxu_dtype
        # nn.LayerNorm(dim) init: weight = ones, bias = zeros (learnable).
        self.gamma = jnp.ones((dim,), jnp.float32) if gamma is None else gamma
        self.beta = jnp.zeros((dim,), jnp.float32) if beta is None else beta

    def __call__(self, x, **kwargs):
        B, S, D = x.shape
        x2d = x.reshape(B * S, D)
        if self.linear_params is not None:
            w, b = self.linear_params
            out2d = prenorm_linear_pallas(x2d, self.gamma, self.beta, w, b,
                                          eps=self.eps, mxu_dtype=self.mxu_dtype)
            return out2d.reshape(B, S, w.shape[1])
        if self.elementwise_fn is not None and self.fn is None:
            y2d = layernorm_pallas(x2d, self.gamma, self.beta, eps=self.eps,
                                   epilogue=self.elementwise_fn)
            return y2d.reshape(B, S, D)
        y2d = layernorm_pallas(x2d, self.gamma, self.beta, eps=self.eps)
        y = y2d.reshape(B, S, D)
        return self.fn(y, **kwargs) if self.fn is not None else y


if __name__ == "__main__":
    B, S, D = 2, 8, 32
    key = jax.random.PRNGKey(0)
    kx, kw, kb, kg, kbe = jax.random.split(key, 5)

    x = jax.random.normal(kx, (B, S, D), jnp.float32)

    # Wrapped fn = Linear(D, D); non-trivial LN affine params to exercise them.
    w = jax.random.normal(kw, (D, D), jnp.float32) * (1.0 / jnp.sqrt(D))
    b = jax.random.normal(kb, (D,), jnp.float32) * 0.01
    gamma = 1.0 + 0.1 * jax.random.normal(kg, (D,), jnp.float32)
    beta = 0.1 * jax.random.normal(kbe, (D,), jnp.float32)

    prenorm = PreNormPallas(D, linear_params=(w, b), gamma=gamma, beta=beta)
    out = jax.block_until_ready(prenorm(x))

    # Reference in plain JAX (LayerNorm + affine + linear).
    mean = jnp.mean(x, axis=-1, keepdims=True)
    var = jnp.mean((x - mean) ** 2, axis=-1, keepdims=True)
    y_ref = (x - mean) * jax.lax.rsqrt(var + 1e-5) * gamma + beta
    ref = jnp.einsum("bsd,de->bse", y_ref, w) + b
    assert out.shape == (B, S, D)
    assert jnp.allclose(out, ref, atol=1e-4, rtol=1e-4)

    # Generic PreNorm path with an elementwise fn fused into the LN kernel.
    prenorm_gen = PreNormPallas(D, elementwise_fn=lambda y: y * 2.0,
                                gamma=gamma, beta=beta)
    out2 = jax.block_until_ready(prenorm_gen(x))
    assert jnp.allclose(out2, y_ref * 2.0, atol=1e-4, rtol=1e-4)

    # Arbitrary (non-fusable) fn path: LN in Pallas, fn applied outside.
    prenorm_fn = PreNormPallas(D, fn=lambda y: jnp.tanh(y),
                               gamma=gamma, beta=beta)
    out3 = jax.block_until_ready(prenorm_fn(x))
    assert jnp.allclose(out3, jnp.tanh(y_ref), atol=1e-4, rtol=1e-4)

    print("KERNEL_OK")
</pallas_src>

<mosaic_0001>
module attributes {stable_mosaic.version = 11 : i64} {
  func.func @_prenorm_linear_kernel(%arg0: i32, %arg1: i32, %arg2: memref<16x32xf32, #tpu.memory_space<vmem>>, %arg3: memref<1x32xf32, #tpu.memory_space<vmem>>, %arg4: memref<1x32xf32, #tpu.memory_space<vmem>>, %arg5: memref<32x32xf32, #tpu.memory_space<vmem>>, %arg6: memref<1x32xf32, #tpu.memory_space<vmem>>, %arg7: memref<16x32xf32, #tpu.memory_space<vmem>>) attributes {dimension_semantics = [#tpu.dimension_semantics<parallel>, #tpu.dimension_semantics<parallel>], iteration_bounds = array<i64: 1, 1>, scalar_prefetch = 0 : i64, scratch_operands = 0 : i64, tpu.core_type = #tpu.core_type<tc>, window_params = [{transform_indices = @transform_0, window_bounds = array<i64: 16, 32>}, {pipeline_mode = #tpu.pipeline_mode<synchronous>, transform_indices = @transform_1, window_bounds = array<i64: 1, 32>}, {pipeline_mode = #tpu.pipeline_mode<synchronous>, transform_indices = @transform_2, window_bounds = array<i64: 1, 32>}, {pipeline_mode = #tpu.pipeline_mode<synchronous>, transform_indices = @transform_3, window_bounds = array<i64: 32, 32>}, {pipeline_mode = #tpu.pipeline_mode<synchronous>, transform_indices = @transform_4, window_bounds = array<i64: 1, 32>}, {transform_indices = @transform_5, window_bounds = array<i64: 16, 32>}]} {
    %c0 = arith.constant 0 : index
    %c0_0 = arith.constant 0 : index
    %0 = vector.load %arg2[%c0, %c0_0] : memref<16x32xf32, #tpu.memory_space<vmem>>, vector<16x32xf32>
    %cst = arith.constant dense<0.000000e+00> : vector<16xf32>
    %1 = vector.multi_reduction <add>, %0, %cst [1] : vector<16x32xf32> to vector<16xf32>
    %2 = vector.shape_cast %1 : vector<16xf32> to vector<16x1xf32>
    %cst_1 = arith.constant 3.200000e+01 : f32
    %3 = vector.broadcast %cst_1 : f32 to vector<16x1xf32>
    %4 = arith.divf %2, %3 : vector<16x1xf32>
    %5 = arith.mulf %0, %0 : vector<16x32xf32>
    %cst_2 = arith.constant dense<0.000000e+00> : vector<16xf32>
    %6 = vector.multi_reduction <add>, %5, %cst_2 [1] : vector<16x32xf32> to vector<16xf32>
    %7 = vector.shape_cast %6 : vector<16xf32> to vector<16x1xf32>
    %cst_3 = arith.constant 3.200000e+01 : f32
    %8 = vector.broadcast %cst_3 : f32 to vector<16x1xf32>
    %9 = arith.divf %7, %8 : vector<16x1xf32>
    %10 = arith.mulf %4, %4 : vector<16x1xf32>
    %11 = arith.subf %9, %10 : vector<16x1xf32>
    %cst_4 = arith.constant 0.000000e+00 : f32
    %12 = vector.broadcast %cst_4 : f32 to vector<16x1xf32>
    %13 = arith.maximumf %11, %12 : vector<16x1xf32>
    %cst_5 = arith.constant 9.99999974E-6 : f32
    %14 = vector.broadcast %cst_5 : f32 to vector<16x1xf32>
    %15 = arith.addf %13, %14 : vector<16x1xf32>
    %16 = math.rsqrt %15 : vector<16x1xf32>
    %17 = vector.broadcast %4 : vector<16x1xf32> to vector<16x32xf32>
    %18 = arith.subf %0, %17 : vector<16x32xf32>
    %19 = vector.broadcast %16 : vector<16x1xf32> to vector<16x32xf32>
    %20 = arith.mulf %18, %19 : vector<16x32xf32>
    %c0_6 = arith.constant 0 : index
    %c0_7 = arith.constant 0 : index
    %21 = vector.load %arg3[%c0_6, %c0_7] : memref<1x32xf32, #tpu.memory_space<vmem>>, vector<1x32xf32>
    %22 = vector.broadcast %21 : vector<1x32xf32> to vector<16x32xf32>
    %23 = arith.mulf %20, %22 : vector<16x32xf32>
    %c0_8 = arith.constant 0 : index
    %c0_9 = arith.constant 0 : index
    %24 = vector.load %arg4[%c0_8, %c0_9] : memref<1x32xf32, #tpu.memory_space<vmem>>, vector<1x32xf32>
    %25 = vector.broadcast %24 : vector<1x32xf32> to vector<16x32xf32>
    %26 = arith.addf %23, %25 : vector<16x32xf32>
    %c0_10 = arith.constant 0 : index
    %c0_11 = arith.constant 0 : index
    %27 = vector.load %arg5[%c0_10, %c0_11] : memref<32x32xf32, #tpu.memory_space<vmem>>, vector<32x32xf32>
    %cst_12 = arith.constant dense<0.000000e+00> : vector<16x32xf32>
    %28 = tpu.matmul %26, %27, %cst_12 {dimension_numbers = #tpu.dot_dimension_numbers<[1], [0], [0], [1], [0, 0, 1, 1], [], []>} : vector<16x32xf32>, vector<32x32xf32>, vector<16x32xf32> -> vector<16x32xf32>
    %c0_13 = arith.constant 0 : index
    %c0_14 = arith.constant 0 : index
    %29 = vector.load %arg6[%c0_13, %c0_14] : memref<1x32xf32, #tpu.memory_space<vmem>>, vector<1x32xf32>
    %30 = vector.broadcast %29 : vector<1x32xf32> to vector<16x32xf32>
    %31 = arith.addf %28, %30 : vector<16x32xf32>
    %c0_15 = arith.constant 0 : index
    %c0_16 = arith.constant 0 : index
    %32 = vector.load %arg7[%c0_15, %c0_16] : memref<16x32xf32, #tpu.memory_space<vmem>>, vector<16x32xf32>
    tpu.vector_store %arg7[%c0_15, %c0_16], %31 {strides = array<i32>} : memref<16x32xf32, #tpu.memory_space<vmem>>, vector<16x32xf32>,
    return
  }
  func.func @transform_0(%arg0: i32, %arg1: i32) -> (i32, i32) {
    %c0_i32 = arith.constant 0 : i32
    %c0_i32_0 = arith.constant 0 : i32
    return %arg0, %c0_i32 : i32, i32
  }
  func.func @transform_1(%arg0: i32, %arg1: i32) -> (i32, i32) {
    %c0_i32 = arith.constant 0 : i32
    %c0_i32_0 = arith.constant 0 : i32
    %c0_i32_1 = arith.constant 0 : i32
    return %c0_i32, %c0_i32_0 : i32, i32
  }
  func.func @transform_2(%arg0: i32, %arg1: i32) -> (i32, i32) {
    %c0_i32 = arith.constant 0 : i32
    %c0_i32_0 = arith.constant 0 : i32
    %c0_i32_1 = arith.constant 0 : i32
    return %c0_i32, %c0_i32_0 : i32, i32
  }
  func.func @transform_3(%arg0: i32, %arg1: i32) -> (i32, i32) {
    %c0_i32 = arith.constant 0 : i32
    %c0_i32_0 = arith.constant 0 : i32
    return %c0_i32, %arg1 : i32, i32
  }
  func.func @transform_4(%arg0: i32, %arg1: i32) -> (i32, i32) {
    %c0_i32 = arith.constant 0 : i32
    %c0_i32_0 = arith.constant 0 : i32
    return %c0_i32, %arg1 : i32, i32
  }
  func.func @transform_5(%arg0: i32, %arg1: i32) -> (i32, i32) {
    %c0_i32 = arith.constant 0 : i32
    return %arg0, %arg1 : i32, i32
  }
}

module attributes {stable_mosaic.version = 11 : i64} {
  func.func @_prenorm_linear_kernel(%arg0: i32, %arg1: i32, %arg2: memref<16x32xf32, #tpu.memory_space<vmem>>, %arg3: memref<1x32xf32, #tpu.memory_space<vmem>>, %arg4: memref<1x32xf32, #tpu.memory_space<vmem>>, %arg5: memref<32x32xf32, #tpu.memory_space<vmem>>, %arg6: memref<1x32xf32, #tpu.memory_space<vmem>>, %arg7: memref<16x32xf32, #tpu.memory_space<vmem>>) attributes {dimension_semantics = [#tpu.dimension_semantics<parallel>, #tpu.dimension_semantics<parallel>], iteration_bounds = array<i64: 1, 1>, scalar_prefetch = 0 : i64, scratch_operands = 0 : i64, tpu.core_type = #tpu.core_type<tc>, window_params = [{transform_indices = @transform_0, window_bounds = array<i64: 16, 32>}, {pipeline_mode = #tpu.pipeline_mode<synchronous>, transform_indices = @transform_1, window_bounds = array<i64: 1, 32>}, {pipeline_mode = #tpu.pipeline_mode<synchronous>, transform_indices = @transform_2, window_bounds = array<i64: 1, 32>}, {transform_indices = @transform_3, window_bounds = array<i64: 32, 32>}, {transform_indices = @transform_4, window_bounds = array<i64: 1, 32>}, {transform_indices = @transform_5, window_bounds = array<i64: 16, 32>}]} {
    %c0 = arith.constant 0 : index
    %c0_0 = arith.constant 0 : index
    %0 = vector.load %arg2[%c0, %c0_0] : memref<16x32xf32, #tpu.memory_space<vmem>>, vector<16x32xf32>
    %cst = arith.constant dense<0.000000e+00> : vector<16xf32>
    %1 = vector.multi_reduction <add>, %0, %cst [1] : vector<16x32xf32> to vector<16xf32>
    %2 = vector.shape_cast %1 : vector<16xf32> to vector<16x1xf32>
    %cst_1 = arith.constant 3.200000e+01 : f32
    %3 = vector.broadcast %cst_1 : f32 to vector<16x1xf32>
    %4 = arith.divf %2, %3 : vector<16x1xf32>
    %5 = arith.mulf %0, %0 : vector<16x32xf32>
    %cst_2 = arith.constant dense<0.000000e+00> : vector<16xf32>
    %6 = vector.multi_reduction <add>, %5, %cst_2 [1] : vector<16x32xf32> to vector<16xf32>
    %7 = vector.shape_cast %6 : vector<16xf32> to vector<16x1xf32>
    %cst_3 = arith.constant 3.200000e+01 : f32
    %8 = vector.broadcast %cst_3 : f32 to vector<16x1xf32>
    %9 = arith.divf %7, %8 : vector<16x1xf32>
    %10 = arith.mulf %4, %4 : vector<16x1xf32>
    %11 = arith.subf %9, %10 : vector<16x1xf32>
    %cst_4 = arith.constant 0.000000e+00 : f32
    %12 = vector.broadcast %cst_4 : f32 to vector<16x1xf32>
    %13 = arith.maximumf %11, %12 : vector<16x1xf32>
    %cst_5 = arith.constant 9.99999974E-6 : f32
    %14 = vector.broadcast %cst_5 : f32 to vector<16x1xf32>
    %15 = arith.addf %13, %14 : vector<16x1xf32>
    %16 = math.rsqrt %15 : vector<16x1xf32>
    %17 = vector.broadcast %4 : vector<16x1xf32> to vector<16x32xf32>
    %18 = arith.subf %0, %17 : vector<16x32xf32>
    %19 = vector.broadcast %16 : vector<16x1xf32> to vector<16x32xf32>
    %20 = arith.mulf %18, %19 : vector<16x32xf32>
    %c0_6 = arith.constant 0 : index
    %c0_7 = arith.constant 0 : index
    %21 = vector.load %arg3[%c0_6, %c0_7] : memref<1x32xf32, #tpu.memory_space<vmem>>, vector<1x32xf32>
    %22 = vector.broadcast %21 : vector<1x32xf32> to vector<16x32xf32>
    %23 = arith.mulf %20, %22 : vector<16x32xf32>
    %c0_8 = arith.constant 0 : index
    %c0_9 = arith.constant 0 : index
    %24 = vector.load %arg4[%c0_8, %c0_9] : memref<1x32xf32, #tpu.memory_space<vmem>>, vector<1x32xf32>
    %25 = vector.broadcast %24 : vector<1x32xf32> to vector<16x32xf32>
    %26 = arith.addf %23, %25 : vector<16x32xf32>
    %c0_10 = arith.constant 0 : index
    %c0_11 = arith.constant 0 : index
    %27 = vector.load %arg5[%c0_10, %c0_11] : memref<32x32xf32, #tpu.memory_space<vmem>>, vector<32x32xf32>
    %cst_12 = arith.constant dense<0.000000e+00> : vector<16x32xf32>
    %28 = tpu.matmul %26, %27, %cst_12 {dimension_numbers = #tpu.dot_dimension_numbers<[1], [0], [0], [1], [0, 0, 1, 1], [], []>} : vector<16x32xf32>, vector<32x32xf32>, vector<16x32xf32> -> vector<16x32xf32>
    %c0_13 = arith.constant 0 : index
    %c0_14 = arith.constant 0 : index
    %29 = vector.load %arg6[%c0_13, %c0_14] : memref<1x32xf32, #tpu.memory_space<vmem>>, vector<1x32xf32>
    %30 = vector.broadcast %29 : vector<1x32xf32> to vector<16x32xf32>
    %31 = arith.addf %28, %30 : vector<16x32xf32>
    %c0_15 = arith.constant 0 : index
    %c0_16 = arith.constant 0 : index
    %32 = vector.load %arg7[%c0_15, %c0_16] : memref<16x32xf32, #tpu.memory_space<vmem>>, vector<16x32xf32>
    tpu.vector_store %arg7[%c0_15, %c0_16], %31 {strides = array<i32>} : memref<16x32xf32, #tpu.memory_space<vmem>>, vector<16x32xf32>,
    return
  }
  func.func @transform_0(%arg0: i32, %arg1: i32) -> (i32, i32) {
    %c0_i32 = arith.constant 0 : i32
    %c0_i32_0 = arith.constant 0 : i32
    return %arg0, %c0_i32 : i32, i32
  }
  func.func @transform_1(%arg0: i32, %arg1: i32) -> (i32, i32) {
    %c0_i32 = arith.constant 0 : i32
    %c0_i32_0 = arith.constant 0 : i32
    %c0_i32_1 = arith.constant 0 : i32
    return %c0_i32, %c0_i32_0 : i32, i32
  }
  func.func @transform_2(%arg0: i32, %arg1: i32) -> (i32, i32) {
    %c0_i32 = arith.constant 0 : i32
    %c0_i32_0 = arith.constant 0 : i32
    %c0_i32_1 = arith.constant 0 : i32
    return %c0_i32, %c0_i32_0 : i32, i32
  }
  func.func @transform_3(%arg0: i32, %arg1: i32) -> (i32, i32) {
    %c0_i32 = arith.constant 0 : i32
    %c0_i32_0 = arith.constant 0 : i32
    return %c0_i32, %arg1 : i32, i32
  }
  func.func @transform_4(%arg0: i32, %arg1: i32) -> (i32, i32) {
    %c0_i32 = arith.constant 0 : i32
    %c0_i32_0 = arith.constant 0 : i32
    return %c0_i32, %arg1 : i32, i32
  }
  func.func @transform_5(%arg0: i32, %arg1: i32) -> (i32, i32) {
    %c0_i32 = arith.constant 0 : i32
    return %arg0, %arg1 : i32, i32
  }
}

</mosaic_0001>

<bundles_post_ra>
// kernel: tpu_custom_call.1
= control target key start
LH: loop header
LB: loop body
LE: loop exit
PB: predicated region body
PF: predicated region fallthrough
CT: control target
= control target key end

     0   :  { %10 = vsyncpa [#allocation3], 0  ;;  %s382_s0 = inlined_call_operand.hbm [shape: f32[16,32], index: 0, kind: input, shape index: {}]   ;;  %s383_s1 = inlined_call_operand.vmem [shape: f32[1,32], index: 1, kind: input, shape index: {}]   ;;  %s384_s2 = inlined_call_operand.vmem [shape: f32[1,32], index: 2, kind: input, shape index: {}]   ;;  %s385_s3 = inlined_call_operand.hbm [shape: f32[32,32], index: 3, kind: input, shape index: {}]   ;;  %s386_s4 = inlined_call_operand.vmem [shape: f32[1,32], index: 4, kind: input, shape index: {}]   ;;  %s387_s5 = inlined_call_operand.hbm [shape: f32[16,32], index: 5, kind: output, shape index: {}]  }
   0x1   :  { %11 = vsyncpa [#allocation6], 0 }
   0x2   :  { %12 = vsyncpa [#allocation4], 0  ;;  %s312_s18 = smov [#allocation2]  }
   0x3   :  { %s18_s19 = sshll.u32 %s312_s18, 4  ;;  %s19_s19 = int_to_ptr.vmem [resolvable:$true] %s18_s19 }
   0x4   :  { %s254_s20 = scalar_lea.vmem %s19_s19, 256  ;;  %p259_p1 = scmp.lt.s32.totalorder %s19_s19, %s19_s19 }
   0x5   :  { %p255_p0 = scmp.ne.s32.totalorder %s19_s19, %s254_s20  ;;  %p260_p2 = scmp.lt.s32.totalorder %s254_s20, %s254_s20 }
   0x7   :  { %p261_p3 = por %p260_p2, %p259_p1 }
   0x9   :  { %p262_p4 = pnand %p261_p3, %p255_p0 }
   0xb   :  { %265 = shalt.err (!%p262_p4)
}
   0xc   :  { %s313_s21 = smov 128   ;;  %s314_s22 = smov 8  }
   0xd   :  { %24 = dma.hbm_to_vmem [thread:$0]  %s382_s0, 256, %s19_s19, [#allocation3], %s313_s21, %s313_s21, %s314_s22  }
   0xe   :  { %s315_s25 = smov [#allocation5]  }
   0xf   :  { %s34_s26 = sshll.u32 %s315_s25, 4  ;;  %s35_s26 = int_to_ptr.vmem [resolvable:$true] %s34_s26 }
  0x10   :  { %s274_s27 = scalar_lea.vmem %s35_s26, 512  ;;  %p279_p6 = scmp.lt.s32.totalorder %s35_s26, %s35_s26 }
  0x11   :  { %p275_p5 = scmp.ne.s32.totalorder %s35_s26, %s274_s27  ;;  %p280_p7 = scmp.lt.s32.totalorder %s274_s27, %s274_s27 }
  0x13   :  { %p281_p8 = por %p280_p7, %p279_p6 }
  0x15   :  { %p282_p9 = pnand %p281_p8, %p275_p5 }
  0x17   :  { %285 = shalt.err (!%p282_p9)
}
  0x18   :  { %40 = dma.hbm_to_vmem [thread:$0]  %s385_s3, 512, %s35_s26, [#allocation6], %s313_s21, %s313_s21, %s314_s22  }
  0x19   :  { %306 = dma.done.wait [#allocation3], 256  }
  0x1a   :  { %307 = vsyncadd [#allocation3], 4294967040 }
  0x1b   :  { %308 = dma.done.wait [#allocation6], 512  }
  0x1c   :  { %309 = vsyncadd [#allocation6], 4294966784  ;;  %vm51_vm0 = vcmask 261120   ;;  %v49_v0 = vld [vmem:[#allocation2] sm:$0xff]  ;;  %v50_v1 = vld [vmem:[#allocation2 + $0x8] sm:$0xff] }
  0x1d   :  { %v52_v2 = vsel %vm51_vm0, %v49_v0, 0.0  ;;  %v61_v3 = vmul.f32 %v49_v0, %v49_v0  ;;  %v62_v4 = vmul.f32 %v50_v1, %v50_v1  ;;  %v55_v6 = vsel %vm51_vm0, %v50_v1, 0.0  ;;  %v106_v8 = vld [vmem:[#allocation5 + $0x18] sm:$0xff]  ;;  %v105_v9 = vld [vmem:[#allocation5 + $0x10] sm:$0xff]  ;;  %v104_v10 = vld [vmem:[#allocation5 + $0x8] sm:$0xff] }
  0x1e   :  { %53 = vadd.xlane.f32.xlu0 %v52_v2  ;;  %226 = vmatprep.subr.mxu0 %v106_v8  ;;  %v103_v11 = vld [vmem:[#allocation5] sm:$0xff]  ;;  %v215_v30 = vld [vmem:[%s383_s1] ss:$0 sm:$0xff]  ;;  %s316_s1 = smov [#allocation7]  }
  0x1f   :  { %v63_v5 = vsel %vm51_vm0, %v61_v3, 0.0  ;;  %v66_v7 = vsel %vm51_vm0, %v62_v4, 0.0  ;;  %227 = vmatpush3.msra.mxu0 %v106_v8  ;;  %v216_v32 = vld [vmem:[%s384_s2] ss:$0 sm:$0xff]  ;;  %s202_s9 = sshll.u32 %s316_s1, 4  ;;  %s203_s9 = int_to_ptr.vmem [resolvable:$true] %s202_s9 }
  0x20   :  { %64 = vadd.xlane.f32.xlu1 %v63_v5  ;;  %228 = vmatprep.subr.mxu0 %v105_v9  ;;  %v217_v40 = vld [vmem:[%s386_s4] ss:$0 sm:$0xff]  ;;  %s286_s2 = scalar_lea.vmem %s203_s9, 256  ;;  %p291_p11 = scmp.lt.s32.totalorder %s203_s9, %s203_s9 }
  0x21   :  { %229 = vmatpush3.msra.mxu0 %v105_v9  ;;  %p287_p10 = scmp.ne.s32.totalorder %s203_s9, %s286_s2  ;;  %p292_p12 = scmp.lt.s32.totalorder %s286_s2, %s286_s2 }
  0x22   :  { %56 = vadd.xlane.f32.xlu0 %v55_v6  ;;  %230 = vmatprep.subr.mxu0 %v104_v10 }
  0x23   :  { %231 = vmatpush3.msra.mxu0 %v104_v10  ;;  %p293_p13 = por %p292_p12, %p291_p11 }
  0x24   :  { %67 = vadd.xlane.f32.xlu1 %v66_v7  ;;  %232 = vmatprep.subr.mxu0 %v103_v11 }
  0x25   :  { %233 = vmatpush3.msra.mxu0 %v103_v11  ;;  %p294_p0 = pnand %p293_p13, %p287_p10 }
  0xa7   :  { %v54_v12 = vpop.xlane.xlu0 %53 }
  0xa8   :  { %v59_v13 = vmul.f32 0.03125, %v54_v12 }
  0xa9   :  { %v65_v14 = vpop.xlane.xlu1 %64 }
  0xaa   :  { %v71_v15 = vmul.f32 %v59_v13, %v59_v13  ;;  %v69_v16 = vmul.f32 0.03125, %v65_v14  ;;  %v81_v28 = vsub.f32 %v49_v0, %v59_v13 }
  0xab   :  { %v57_v17 = vpop.xlane.xlu0 %56 }
  0xac   :  { %v73_v18 = vsub.f32 %v69_v16, %v71_v15  ;;  %v60_v19 = vmul.f32 0.03125, %v57_v17 }
  0xad   :  { %v68_v20 = vpop.xlane.xlu1 %67 }
  0xae   :  { %v75_v21 = vmax.f32 %v73_v18, 0.0  ;;  %v72_v22 = vmul.f32 %v60_v19, %v60_v19  ;;  %v70_v23 = vmul.f32 0.03125, %v68_v20  ;;  %v82_v33 = vsub.f32 %v50_v1, %v60_v19 }
  0xb0   :  { %v77_v24 = vadd.f32 1e-05, %v75_v21  ;;  %v74_v25 = vsub.f32 %v70_v23, %v72_v22 }
  0xb2   :  { %242 = vrsqrt.f32 %v77_v24  ;;  %v76_v26 = vmax.f32 %v74_v25, 0.0 }
  0xb4   :  { %v78_v27 = vadd.f32 1e-05, %v76_v26 }
  0xb6   :  { %244 = vrsqrt.f32 %v78_v27 }
  0xbf   :  { %v243_v29 = vpop.eup %242 }
  0xc0   :  { %v83_v31 = vmul.f32 %v243_v29, %v81_v28 }
  0xc2   :  { %v92_v34 = vmul.f32 %v215_v30, %v83_v31 }
  0xc3   :  { %v245_v35 = vpop.eup %244 }
  0xc4   :  { %v84_v36 = vmul.f32 %v245_v35, %v82_v33  ;;  %v101_v37 = vadd.f32 %v216_v32, %v92_v34 }
  0xc6   :  { %v93_v38 = vmul.f32 %v215_v30, %v84_v36  ;;  %234 = vmatprep.mubr.msk.f32.mxu0 %vm51_vm0, %v101_v37 }
  0xc8   :  { %v102_v39 = vadd.f32 %v216_v32, %v93_v38 }
  0xca   :  { %235 = vmatmul.mubr.msk.f32.vlgmr.msra.gmra.mxu0 %vm51_vm0, %v102_v39 }
 0x18a   :  { %v236_v41 = vpop.f32.mrf.mxu0 }
 0x18b   :  { %v192_v42 = vadd.f32 %v236_v41, %v217_v40 }
 0x18c   :  { %v186_v43 = vpop.f32.mrf.mxu0 }
 0x18d   :  { %196 = vst.msk [vmem:[#allocation7 + $0x8] sm:$0xff] %vm51_vm0, %v192_v42  ;;  %v187_v44 = vadd.f32 %v217_v40, %v186_v43 }
 0x18f   :  { %195 = vst.msk [vmem:[#allocation7] sm:$0xff] %vm51_vm0, %v187_v44 }
 0x190   :  { %297 = shalt.err (!%p294_p0)
}
 0x191   :  { %208 = dma.vmem_to_hbm [thread:$0]  %s203_s9, 256, %s387_s5, [#allocation4], %s313_s21, %s313_s21, %s314_s22  }
 0x192   :  { %310 = dma.done.wait [#allocation4], 256  }
 0x193   :  { %311 = vsyncadd [#allocation4], 4294967040 }
 0x194   :  { %212 = vsyncpa [#allocation3], 1 }
 0x195   :  { %213 = vsyncpa [#allocation6], 1 }
 0x196   :  { %214 = vsyncpa [#allocation4], 1 }

// kernel: tpu_custom_call.1
= control target key start
LH: loop header
LB: loop body
LE: loop exit
PB: predicated region body
PF: predicated region fallthrough
CT: control target
= control target key end

     0   :  { %10 = vsyncpa [#allocation3], 0  ;;  %s382_s0 = inlined_call_operand.hbm [shape: f32[16,32], index: 0, kind: input, shape index: {}]   ;;  %s383_s1 = inlined_call_operand.vmem [shape: f32[1,32], index: 1, kind: input, shape index: {}]   ;;  %s384_s2 = inlined_call_operand.vmem [shape: f32[1,32], index: 2, kind: input, shape index: {}]   ;;  %s385_s3 = inlined_call_operand.hbm [shape: f32[32,32], index: 3, kind: input, shape index: {}]   ;;  %s386_s4 = inlined_call_operand.vmem [shape: f32[1,32], index: 4, kind: input, shape index: {}]   ;;  %s387_s5 = inlined_call_operand.hbm [shape: f32[16,32], index: 5, kind: output, shape index: {}]  }
   0x1   :  { %11 = vsyncpa [#allocation6], 0 }
   0x2   :  { %12 = vsyncpa [#allocation4], 0  ;;  %s312_s18 = smov [#allocation2]  }
   0x3   :  { %s18_s19 = sshll.u32 %s312_s18, 4  ;;  %s19_s19 = int_to_ptr.vmem [resolvable:$true] %s18_s19 }
   0x4   :  { %s254_s20 = scalar_lea.vmem %s19_s19, 256  ;;  %p259_p1 = scmp.lt.s32.totalorder %s19_s19, %s19_s19 }
   0x5   :  { %p255_p0 = scmp.ne.s32.totalorder %s19_s19, %s254_s20  ;;  %p260_p2 = scmp.lt.s32.totalorder %s254_s20, %s254_s20 }
   0x7   :  { %p261_p3 = por %p260_p2, %p259_p1 }
   0x9   :  { %p262_p4 = pnand %p261_p3, %p255_p0 }
   0xb   :  { %265 = shalt.err (!%p262_p4)
}
   0xc   :  { %s313_s21 = smov 128   ;;  %s314_s22 = smov 8  }
   0xd   :  { %24 = dma.hbm_to_vmem [thread:$0]  %s382_s0, 256, %s19_s19, [#allocation3], %s313_s21, %s313_s21, %s314_s22  }
   0xe   :  { %s315_s25 = smov [#allocation5]  }
   0xf   :  { %s34_s26 = sshll.u32 %s315_s25, 4  ;;  %s35_s26 = int_to_ptr.vmem [resolvable:$true] %s34_s26 }
  0x10   :  { %s274_s27 = scalar_lea.vmem %s35_s26, 512  ;;  %p279_p6 = scmp.lt.s32.totalorder %s35_s26, %s35_s26 }
  0x11   :  { %p275_p5 = scmp.ne.s32.totalorder %s35_s26, %s274_s27  ;;  %p280_p7 = scmp.lt.s32.totalorder %s274_s27, %s274_s27 }
  0x13   :  { %p281_p8 = por %p280_p7, %p279_p6 }
  0x15   :  { %p282_p9 = pnand %p281_p8, %p275_p5 }
  0x17   :  { %285 = shalt.err (!%p282_p9)
}
  0x18   :  { %40 = dma.hbm_to_vmem [thread:$0]  %s385_s3, 512, %s35_s26, [#allocation6], %s313_s21, %s313_s21, %s314_s22  }
  0x19   :  { %306 = dma.done.wait [#allocation3], 256  }
  0x1a   :  { %307 = vsyncadd [#allocation3], 4294967040 }
  0x1b   :  { %308 = dma.done.wait [#allocation6], 512  }
  0x1c   :  { %309 = vsyncadd [#allocation6], 4294966784  ;;  %vm51_vm0 = vcmask 261120   ;;  %v49_v0 = vld [vmem:[#allocation2] sm:$0xff]  ;;  %v50_v1 = vld [vmem:[#allocation2 + $0x8] sm:$0xff] }
  0x1d   :  { %v52_v2 = vsel %vm51_vm0, %v49_v0, 0.0  ;;  %v61_v3 = vmul.f32 %v49_v0, %v49_v0  ;;  %v62_v4 = vmul.f32 %v50_v1, %v50_v1  ;;  %v55_v6 = vsel %vm51_vm0, %v50_v1, 0.0  ;;  %v106_v8 = vld [vmem:[#allocation5 + $0x18] sm:$0xff]  ;;  %v105_v9 = vld [vmem:[#allocation5 + $0x10] sm:$0xff]  ;;  %v104_v10 = vld [vmem:[#allocation5 + $0x8] sm:$0xff] }
  0x1e   :  { %53 = vadd.xlane.f32.xlu0 %v52_v2  ;;  %226 = vmatprep.subr.mxu0 %v106_v8  ;;  %v103_v11 = vld [vmem:[#allocation5] sm:$0xff]  ;;  %v215_v30 = vld [vmem:[%s383_s1] ss:$0 sm:$0xff]  ;;  %s316_s1 = smov [#allocation7]  }
  0x1f   :  { %v63_v5 = vsel %vm51_vm0, %v61_v3, 0.0  ;;  %v66_v7 = vsel %vm51_vm0, %v62_v4, 0.0  ;;  %227 = vmatpush3.msra.mxu0 %v106_v8  ;;  %v216_v32 = vld [vmem:[%s384_s2] ss:$0 sm:$0xff]  ;;  %s202_s9 = sshll.u32 %s316_s1, 4  ;;  %s203_s9 = int_to_ptr.vmem [resolvable:$true] %s202_s9 }
  0x20   :  { %64 = vadd.xlane.f32.xlu1 %v63_v5  ;;  %228 = vmatprep.subr.mxu0 %v105_v9  ;;  %v217_v40 = vld [vmem:[%s386_s4] ss:$0 sm:$0xff]  ;;  %s286_s2 = scalar_lea.vmem %s203_s9, 256  ;;  %p291_p11 = scmp.lt.s32.totalorder %s203_s9, %s203_s9 }
  0x21   :  { %229 = vmatpush3.msra.mxu0 %v105_v9  ;;  %p287_p10 = scmp.ne.s32.totalorder %s203_s9, %s286_s2  ;;  %p292_p12 = scmp.lt.s32.totalorder %s286_s2, %s286_s2 }
  0x22   :  { %56 = vadd.xlane.f32.xlu0 %v55_v6  ;;  %230 = vmatprep.subr.mxu0 %v104_v10 }
  0x23   :  { %231 = vmatpush3.msra.mxu0 %v104_v10  ;;  %p293_p13 = por %p292_p12, %p291_p11 }
  0x24   :  { %67 = vadd.xlane.f32.xlu1 %v66_v7  ;;  %232 = vmatprep.subr.mxu0 %v103_v11 }
  0x25   :  { %233 = vmatpush3.msra.mxu0 %v103_v11  ;;  %p294_p0 = pnand %p293_p13, %p287_p10 }
  0xa7   :  { %v54_v12 = vpop.xlane.xlu0 %53 }
  0xa8   :  { %v59_v13 = vmul.f32 0.03125, %v54_v12 }
  0xa9   :  { %v65_v14 = vpop.xlane.xlu1 %64 }
  0xaa   :  { %v71_v15 = vmul.f32 %v59_v13, %v59_v13  ;;  %v69_v16 = vmul.f32 0.03125, %v65_v14  ;;  %v81_v28 = vsub.f32 %v49_v0, %v59_v13 }
  0xab   :  { %v57_v17 = vpop.xlane.xlu0 %56 }
  0xac   :  { %v73_v18 = vsub.f32 %v69_v16, %v71_v15  ;;  %v60_v19 = vmul.f32 0.03125, %v57_v17 }
  0xad   :  { %v68_v20 = vpop.xlane.xlu1 %67 }
  0xae   :  { %v75_v21 = vmax.f32 %v73_v18, 0.0  ;;  %v72_v22 = vmul.f32 %v60_v19, %v60_v19  ;;  %v70_v23 = vmul.f32 0.03125, %v68_v20  ;;  %v82_v33 = vsub.f32 %v50_v1, %v60_v19 }
  0xb0   :  { %v77_v24 = vadd.f32 1e-05, %v75_v21  ;;  %v74_v25 = vsub.f32 %v70_v23, %v72_v22 }
  0xb2   :  { %242 = vrsqrt.f32 %v77_v24  ;;  %v76_v26 = vmax.f32 %v74_v25, 0.0 }
  0xb4   :  { %v78_v27 = vadd.f32 1e-05, %v76_v26 }
  0xb6   :  { %244 = vrsqrt.f32 %v78_v27 }
  0xbf   :  { %v243_v29 = vpop.eup %242 }
  0xc0   :  { %v83_v31 = vmul.f32 %v243_v29, %v81_v28 }
  0xc2   :  { %v92_v34 = vmul.f32 %v215_v30, %v83_v31 }
  0xc3   :  { %v245_v35 = vpop.eup %244 }
  0xc4   :  { %v84_v36 = vmul.f32 %v245_v35, %v82_v33  ;;  %v101_v37 = vadd.f32 %v216_v32, %v92_v34 }
  0xc6   :  { %v93_v38 = vmul.f32 %v215_v30, %v84_v36  ;;  %234 = vmatprep.mubr.msk.f32.mxu0 %vm51_vm0, %v101_v37 }
  0xc8   :  { %v102_v39 = vadd.f32 %v216_v32, %v93_v38 }
  0xca   :  { %235 = vmatmul.mubr.msk.f32.vlgmr.msra.gmra.mxu0 %vm51_vm0, %v102_v39 }
 0x18a   :  { %v236_v41 = vpop.f32.mrf.mxu0 }
 0x18b   :  { %v192_v42 = vadd.f32 %v236_v41, %v217_v40 }
 0x18c   :  { %v186_v43 = vpop.f32.mrf.mxu0 }
 0x18d   :  { %196 = vst.msk [vmem:[#allocation7 + $0x8] sm:$0xff] %vm51_vm0, %v192_v42  ;;  %v187_v44 = vadd.f32 %v217_v40, %v186_v43 }
 0x18f   :  { %195 = vst.msk [vmem:[#allocation7] sm:$0xff] %vm51_vm0, %v187_v44 }
 0x190   :  { %297 = shalt.err (!%p294_p0)
}
 0x191   :  { %208 = dma.vmem_to_hbm [thread:$0]  %s203_s9, 256, %s387_s5, [#allocation4], %s313_s21, %s313_s21, %s314_s22  }
 0x192   :  { %310 = dma.done.wait [#allocation4], 256  }
 0x193   :  { %311 = vsyncadd [#allocation4], 4294967040 }
 0x194   :  { %212 = vsyncpa [#allocation3], 1 }
 0x195   :  { %213 = vsyncpa [#allocation6], 1 }
 0x196   :  { %214 = vsyncpa [#allocation4], 1 }

</bundles_post_ra>
